<compile_context>
chip_gen: v7x
topology: tpu7x:2x2x1
jax: 0.10.0
libtpu: 0.0.40
codegen_flags: <defaults>
</compile_context>

<pallas_src>
import jax
import jax.numpy as jnp
from jax.experimental import pallas as pl
from jax.experimental.pallas import tpu as pltpu

N = 128   # number of graph nodes
F = 32    # input feature channels
D = 32    # hidden_channels (latent dim)


# --------------------------------------------------------------------------
# Fused Pallas kernel: GCN encode (pos + K negatives) + PReLU + summary
# --------------------------------------------------------------------------
def dgi_fused_kernel(perm_ref, a_ref, x_ref, w_ref, b_ref, alpha_ref,
                     z_ref, s_ref):
    # perm_ref : (K*N, 1) int32  permutation indices for the K negatives
    # a_ref    : (N, N)   f32    dense normalised adjacency A_hat
    # x_ref    : (N, F)   f32    node features
    # w_ref    : (F, D)   f32    GCN weight
    # b_ref    : (1, D)   f32    GCN bias
    # alpha_ref: (1, 1)   f32    PReLU slope (SMEM scalar)
    # z_ref    : (N, (1+K)*D)    [pos | neg_0 | ... | neg_{K-1}]
    # s_ref    : (1, D)          summary = sigmoid(mean(pos, axis=0))
    n = a_ref.shape[0]
    d = w_ref.shape[1]
    k = perm_ref.shape[0] // n

    # Shared projection, computed exactly once (hoisted out of pos/neg paths).
    xw = jnp.dot(x_ref[...], w_ref[...], preferred_element_type=jnp.float32)

    # Corrupted projections via one-hot permutation matmul on the MXU:
    #   (P @ XW)[i, :] == XW[perm[i], :] == (X[perm] @ W)[i, :]
    col_ids = jax.lax.broadcasted_iota(jnp.int32, (n, n), 1)
    parts = [xw]
    for i in range(k):                                  # static unroll
        perm_col = perm_ref[pl.ds(i * n, n), :]         # (N, 1) int32
        onehot = (perm_col == col_ids).astype(jnp.float32)
        parts.append(jnp.dot(onehot, xw, preferred_element_type=jnp.float32))

    # Single A_hat matmul over the lane-concatenated [pos | negs] RHS.
    rhs = jnp.concatenate(parts, axis=1)                # (N, (1+K)*D)
    z = jnp.dot(a_ref[...], rhs, preferred_element_type=jnp.float32)
    z = z + jnp.concatenate([b_ref[...]] * (1 + k), axis=1)

    # PReLU
    alpha = alpha_ref[0, 0]
    z = jnp.where(z > 0, z, alpha * z)
    z_ref[...] = z

    # summary = sigmoid(mean over nodes of the positive embeddings)
    s_ref[...] = jax.nn.sigmoid(jnp.mean(z[:, :d], axis=0, keepdims=True))


# --------------------------------------------------------------------------
# Wrapper
# --------------------------------------------------------------------------
def dgi_fused(perms, a_hat, x, w, b, alpha):
    n = x.shape[0]
    d = w.shape[1]
    k = perms.shape[0] // n
    z, s = pl.pallas_call(
        dgi_fused_kernel,
        out_shape=(
            jax.ShapeDtypeStruct((n, (1 + k) * d), jnp.float32),
            jax.ShapeDtypeStruct((1, d), jnp.float32),
        ),
        in_specs=[
            pl.BlockSpec(memory_space=pltpu.MemorySpace.VMEM),   # perms
            pl.BlockSpec(memory_space=pltpu.MemorySpace.VMEM),   # a_hat
            pl.BlockSpec(memory_space=pltpu.MemorySpace.VMEM),   # x
            pl.BlockSpec(memory_space=pltpu.MemorySpace.VMEM),   # w
            pl.BlockSpec(memory_space=pltpu.MemorySpace.VMEM),   # b
            pl.BlockSpec(memory_space=pltpu.MemorySpace.SMEM),   # alpha
        ],
        out_specs=(
            pl.BlockSpec(memory_space=pltpu.MemorySpace.VMEM),
            pl.BlockSpec(memory_space=pltpu.MemorySpace.VMEM),
        ),
    )(perms, a_hat, x, w, b, alpha)
    return z, s


def dgi_forward(x, a_hat, params, corruption_key, *, framework="jax",
                num_negatives=1):
    """Mirrors DeepGraphInfomaxWithoutFlexFronts.forward (framework is unused
    plumbing, as in the torch module)."""
    del framework
    w, b, alpha = params["w"], params["b"], params["alpha"]
    n = x.shape[0]
    d = w.shape[1]

    # Row-permutation corruption: only the index vector(s) leave the wrapper;
    # the gather itself happens inside the kernel (no x[perm] materialised).
    if num_negatives == 1:
        perms = jax.random.permutation(corruption_key, n)[None]        # (1, N)
    else:
        keys = jax.random.split(corruption_key, num_negatives)
        perms = jnp.stack([jax.random.permutation(kk, n) for kk in keys])
    perms = perms.astype(jnp.int32).reshape(-1, 1)                     # (K*N, 1)

    z, summary = dgi_fused(perms, a_hat, x, w, b, alpha)

    pos_z = z[:, :d]
    if num_negatives == 1:
        neg_z = z[:, d:2 * d]
    else:
        neg_z = jnp.stack(
            [z[:, (i + 1) * d:(i + 2) * d] for i in range(num_negatives)],
            axis=0)
    return pos_z, neg_z, summary[0]


# --------------------------------------------------------------------------
# Pure-JAX reference for correctness check
# --------------------------------------------------------------------------
def encode_ref(a_hat, x, w, b, alpha):
    z = a_hat @ (x @ w) + b
    return jnp.where(z > 0, z, alpha[0, 0] * z)


if __name__ == "__main__":
    root = jax.random.PRNGKey(0)
    k_x, k_a, k_w, k_b, k_dgi, k_cor = jax.random.split(root, 6)

    # Node features
    x = jax.random.normal(k_x, (N, F), dtype=jnp.float32)

    # Random symmetric adjacency with self-loops, symmetric normalisation
    A = (jax.random.uniform(k_a, (N, N)) < 0.1).astype(jnp.float32)
    A = jnp.clip(jnp.maximum(A, A.T) + jnp.eye(N, dtype=jnp.float32), 0.0, 1.0)
    d_inv_sqrt = 1.0 / jnp.sqrt(A.sum(axis=1))
    a_hat = A * d_inv_sqrt[:, None] * d_inv_sqrt[None, :]

    # Deterministic parameter init (synthetic, matching torch init schemes)
    bound_w = 1.0 / jnp.sqrt(jnp.float32(F))
    params = {
        "w": jax.random.uniform(k_w, (F, D), jnp.float32, -bound_w, bound_w),
        "b": jax.random.uniform(k_b, (1, D), jnp.float32, -bound_w, bound_w),
        "alpha": jnp.full((1, 1), 0.25, dtype=jnp.float32),  # PReLU default
    }
    # DGI discriminator weight (hidden x hidden), uniform(-1/sqrt(D), 1/sqrt(D));
    # used only by discriminate()/loss(), not by forward().
    bound_d = 1.0 / jnp.sqrt(jnp.float32(D))
    dgi_weight = jax.random.uniform(k_dgi, (D, D), jnp.float32,
                                    -bound_d, bound_d)
    # TODO(synk): discriminate()/loss()/loss_info_nce()/test() (use dgi_weight /
    # sklearn) are not part of forward(); only the forward pass is implemented
    # as a Pallas kernel.

    pos_z, neg_z, summary = dgi_forward(x, a_hat, params, k_cor,
                                        framework="jax", num_negatives=1)
    jax.block_until_ready((pos_z, neg_z, summary))

    # Correctness check vs pure-JAX reference
    pos_ref = encode_ref(a_hat, x, params["w"], params["b"], params["alpha"])
    perm = jax.random.permutation(k_cor, N)
    neg_ref = encode_ref(a_hat, x[perm], params["w"], params["b"],
                         params["alpha"])
    sum_ref = jax.nn.sigmoid(pos_ref.mean(axis=0))

    assert pos_z.shape == (N, D) and neg_z.shape == (N, D) and summary.shape == (D,)
    assert jnp.allclose(pos_z, pos_ref, atol=1e-5, rtol=1e-5)
    assert jnp.allclose(neg_z, neg_ref, atol=1e-5, rtol=1e-5)
    assert jnp.allclose(summary, sum_ref, atol=1e-5, rtol=1e-5)

    print("KERNEL_OK")
</pallas_src>

<mosaic_0001>
module attributes {stable_mosaic.version = 11 : i64} {
  func.func @dgi_fused_kernel(%arg0: memref<128x1xi32, #tpu.memory_space<vmem>>, %arg1: memref<128x128xf32, #tpu.memory_space<vmem>>, %arg2: memref<128x32xf32, #tpu.memory_space<vmem>>, %arg3: memref<32x32xf32, #tpu.memory_space<vmem>>, %arg4: memref<1x32xf32, #tpu.memory_space<vmem>>, %arg5: memref<1x1xf32, #tpu.memory_space<smem>>, %arg6: memref<128x64xf32, #tpu.memory_space<vmem>>, %arg7: memref<1x32xf32, #tpu.memory_space<vmem>>) attributes {dimension_semantics = [], scalar_prefetch = 0 : i64, scratch_operands = 0 : i64, tpu.core_type = #tpu.core_type<tc>} {
    %c0 = arith.constant 0 : index
    %c0_0 = arith.constant 0 : index
    %0 = vector.load %arg2[%c0, %c0_0] : memref<128x32xf32, #tpu.memory_space<vmem>>, vector<128x32xf32>
    %c0_1 = arith.constant 0 : index
    %c0_2 = arith.constant 0 : index
    %1 = vector.load %arg3[%c0_1, %c0_2] : memref<32x32xf32, #tpu.memory_space<vmem>>, vector<32x32xf32>
    %cst = arith.constant dense<0.000000e+00> : vector<128x32xf32>
    %2 = tpu.matmul %0, %1, %cst {dimension_numbers = #tpu.dot_dimension_numbers<[1], [0], [0], [1], [0, 0, 1, 1], [], []>} : vector<128x32xf32>, vector<32x32xf32>, vector<128x32xf32> -> vector<128x32xf32>
    %3 = tpu.iota {dimensions = array<i32: 1>} : vector<128x128xi32>
    %c0_3 = arith.constant 0 : index
    %c0_4 = arith.constant 0 : index
    %4 = vector.load %arg0[%c0_3, %c0_4] : memref<128x1xi32, #tpu.memory_space<vmem>>, vector<128x1xi32>
    %5 = vector.broadcast %4 : vector<128x1xi32> to vector<128x128xi32>
    %6 = arith.cmpi eq, %5, %3 : vector<128x128xi32>
    %7 = arith.extui %6 : vector<128x128xi1> to vector<128x128xi32>
    %8 = arith.sitofp %7 : vector<128x128xi32> to vector<128x128xf32>
    %cst_5 = arith.constant dense<0.000000e+00> : vector<128x32xf32>
    %9 = tpu.matmul %8, %2, %cst_5 {dimension_numbers = #tpu.dot_dimension_numbers<[1], [0], [0], [1], [0, 0, 1, 1], [], []>} : vector<128x128xf32>, vector<128x32xf32>, vector<128x32xf32> -> vector<128x32xf32>
    %10 = tpu.concatenate %2, %9 in 1 : vector<128x32xf32>, vector<128x32xf32> -> vector<128x64xf32>
    %c0_6 = arith.constant 0 : index
    %c0_7 = arith.constant 0 : index
    %11 = vector.load %arg1[%c0_6, %c0_7] : memref<128x128xf32, #tpu.memory_space<vmem>>, vector<128x128xf32>
    %cst_8 = arith.constant dense<0.000000e+00> : vector<128x64xf32>
    %12 = tpu.matmul %11, %10, %cst_8 {dimension_numbers = #tpu.dot_dimension_numbers<[1], [0], [0], [1], [0, 0, 1, 1], [], []>} : vector<128x128xf32>, vector<128x64xf32>, vector<128x64xf32> -> vector<128x64xf32>
    %c0_9 = arith.constant 0 : index
    %c0_10 = arith.constant 0 : index
    %13 = vector.load %arg4[%c0_9, %c0_10] : memref<1x32xf32, #tpu.memory_space<vmem>>, vector<1x32xf32>
    %14 = tpu.concatenate %13, %13 in 1 : vector<1x32xf32>, vector<1x32xf32> -> vector<1x64xf32>
    %15 = vector.broadcast %14 : vector<1x64xf32> to vector<128x64xf32>
    %16 = arith.addf %12, %15 : vector<128x64xf32>
    %c0_11 = arith.constant 0 : index
    %c0_12 = arith.constant 0 : index
    %17 = memref.load %arg5[%c0_11, %c0_12] : memref<1x1xf32, #tpu.memory_space<smem>>
    %cst_13 = arith.constant 0.000000e+00 : f32
    %18 = vector.broadcast %cst_13 : f32 to vector<128x64xf32>
    %19 = arith.cmpf ogt, %16, %18 : vector<128x64xf32>
    %20 = vector.broadcast %17 : f32 to vector<128x64xf32>
    %21 = arith.mulf %20, %16 : vector<128x64xf32>
    %22 = arith.select %19, %16, %21 : vector<128x64xi1>, vector<128x64xf32>
    %c0_14 = arith.constant 0 : index
    %c0_15 = arith.constant 0 : index
    %23 = vector.load %arg6[%c0_14, %c0_15] : memref<128x64xf32, #tpu.memory_space<vmem>>, vector<128x64xf32>
    tpu.vector_store %arg6[%c0_14, %c0_15], %22 {strides = array<i32>} : memref<128x64xf32, #tpu.memory_space<vmem>>, vector<128x64xf32>,
    %24 = vector.extract_strided_slice %22 {offsets = [0, 0], sizes = [128, 32], strides = [1, 1]} : vector<128x64xf32> to vector<128x32xf32>
    %cst_16 = arith.constant dense<0.000000e+00> : vector<32xf32>
    %25 = vector.multi_reduction <add>, %24, %cst_16 [0] : vector<128x32xf32> to vector<32xf32>
    %26 = vector.shape_cast %25 : vector<32xf32> to vector<1x32xf32>
    %cst_17 = arith.constant 1.280000e+02 : f32
    %27 = vector.broadcast %cst_17 : f32 to vector<1x32xf32>
    %28 = arith.divf %26, %27 : vector<1x32xf32>
    %29 = arith.negf %28 : vector<1x32xf32>
    %30 = math.exp %29 : vector<1x32xf32>
    %cst_18 = arith.constant 1.000000e+00 : f32
    %31 = vector.broadcast %cst_18 : f32 to vector<1x32xf32>
    %32 = arith.addf %31, %30 : vector<1x32xf32>
    %33 = arith.divf %31, %32 : vector<1x32xf32>
    %c0_19 = arith.constant 0 : index
    %c0_20 = arith.constant 0 : index
    %34 = vector.load %arg7[%c0_19, %c0_20] : memref<1x32xf32, #tpu.memory_space<vmem>>, vector<1x32xf32>
    tpu.vector_store %arg7[%c0_19, %c0_20], %33 {strides = array<i32>} : memref<1x32xf32, #tpu.memory_space<vmem>>, vector<1x32xf32>,
    return
  }
}

</mosaic_0001>

<bundles_post_ra>
// kernel: tpu_custom_call.1
= control target key start
LH: loop header
LB: loop body
LE: loop exit
PB: predicated region body
PF: predicated region fallthrough
CT: control target
= control target key end

     0   :  { %vm47_vm0 = vcmask 261120   ;;  %v1326_v6 = vmov 0   ;;  %s1821_s0 = inlined_call_operand.vmem [shape: s32[128,1], index: 0, kind: input, shape index: {}]   ;;  %s1822_s1 = inlined_call_operand.vmem [shape: f32[128,128], index: 1, kind: input, shape index: {}]   ;;  %s1823_s2 = inlined_call_operand.vmem [shape: f32[128,32], index: 2, kind: input, shape index: {}]   ;;  %s1824_s3 = inlined_call_operand.vmem [shape: f32[32,32], index: 3, kind: input, shape index: {}]   ;;  %s1825_s4 = inlined_call_operand.vmem [shape: f32[1,32], index: 4, kind: input, shape index: {}]   ;;  %s1826_s5 = inlined_call_operand.<no memory space> [shape: f32[1,1], index: 5, kind: input, shape index: {}]   ;;  %s1827_s6 = inlined_call_operand.vmem [shape: f32[128,64], index: 6, kind: output, shape index: {0}]   ;;  %s1828_s7 = inlined_call_operand.hbm [shape: f32[1,32], index: 7, kind: output, shape index: {1}]  }
   0x1   :  { %v43_v0 = vld [vmem:[%s1824_s3] sm:$0xff]  ;;  %v44_v1 = vld [vmem:[%s1824_s3 + $0x8] sm:$0xff]  ;;  %v45_v2 = vld [vmem:[%s1824_s3 + $0x10] sm:$0xff]  ;;  %1256 = vset.pattern.permute.xlu0 %v1326_v6  ;;  %1257 = vset.pattern.permute.xlu1 %v1326_v6 }
   0x2   :  { %v1164_v3 = vpack.c.bf16 %v44_v1, %v43_v0  ;;  %v46_v4 = vld [vmem:[%s1824_s3 + $0x18] sm:$0xff]  ;;  %v27_v5 = vld [vmem:[%s1823_s2] sm:$0xff]  ;;  %v245_v9 = vld [vmem:[%s1821_s0 + $0x10] sm:$0xff] }
   0x3   :  { %v1168_v7 = vpack.c.bf16 %v46_v4, %v45_v2  ;;  %1028 = vmatprep.mubr.msk.f32.mxu0 %vm47_vm0, %v27_v5  ;;  %v243_v8 = vld [vmem:[%s1821_s0] sm:$0xff]  ;;  %v28_v10 = vld [vmem:[%s1823_s2 + $0x8] sm:$0xff]  ;;  %266 = vperm.xlu1 %1257, %v245_v9   ;;  %v29_v12 = vld [vmem:[%s1823_s2 + $0x10] sm:$0xff] }
   0x4   :  { %1165 = vmatprep.subr.bf16.mxu0 %v1164_v3  ;;  %260 = vperm.xlu0 %1256, %v243_v8   ;;  %v244_v11 = vld [vmem:[%s1821_s0 + $0x8] sm:$0xff]  ;;  %v246_v13 = vld [vmem:[%s1821_s0 + $0x18] sm:$0xff]  ;;  %v247_v15 = vld [vmem:[%s1821_s0 + $0x20] sm:$0xff] }
   0x5   :  { %1167 = vmatpush3.bf16.msra.mxu0 %v1164_v3  ;;  %v30_v14 = vld [vmem:[%s1823_s2 + $0x18] sm:$0xff] }
   0x6   :  { %1169 = vmatprep.subr.bf16.mxu0 %v1168_v7 }
   0x7   :  { %269 = vperm.xlu1 %1257, %v246_v13  }
   0x8   :  { %263 = vperm.xlu0 %1256, %v244_v11  }
   0x9   :  { %1171 = vmatpush3.bf16.msra.mxu0 %v1168_v7 }
   0xc   :  { %1029 = vmatmul.mubr.msk.f32.vlgmr.msra.gmra.mrb[0].mxu0 %vm47_vm0, %v28_v10 }
   0xd   :  { %1031 = vmatprep.mubr.msk.f32.mxu0 %vm47_vm0, %v29_v12 }
   0xe   :  { %14 = vsyncpa [#allocation4], 0  ;;  %v31_v16 = vld [vmem:[%s1823_s2 + $0x20] sm:$0xff]  ;;  %v248_v17 = vld [vmem:[%s1821_s0 + $0x28] sm:$0xff]  ;;  %272 = vperm.xlu0 %1256, %v247_v15   ;;  %v241_v39 = vlaneseq  ;;  %v1327_v42 = vmov 1.0  }
   0xf   :  { %v32_v18 = vld [vmem:[%s1823_s2 + $0x28] sm:$0xff]  ;;  %275 = vperm.xlu1 %1257, %v248_v17   ;;  %v249_v19 = vld [vmem:[%s1821_s0 + $0x30] sm:$0xff]  ;;  %v250_v21 = vld [vmem:[%s1821_s0 + $0x38] sm:$0xff] }
  0x10   :  { %1032 = vmatmul.mubr.msk.f32.gmra.mrb[2].mxu0 %vm47_vm0, %v30_v14  ;;  %v33_v20 = vld [vmem:[%s1823_s2 + $0x30] sm:$0xff]  ;;  %v34_v22 = vld [vmem:[%s1823_s2 + $0x38] sm:$0xff]  ;;  %v251_v23 = vld [vmem:[%s1821_s0 + $0x40] sm:$0xff]  ;;  %v1495_v40 = vand.u32 127, %v241_v39 }
  0x11   :  { %1034 = vmatprep.mubr.msk.f32.mxu0 %vm47_vm0, %v31_v16  ;;  %v35_v24 = vld [vmem:[%s1823_s2 + $0x40] sm:$0xff]  ;;  %v252_v25 = vld [vmem:[%s1821_s0 + $0x48] sm:$0xff]  ;;  %v253_v27 = vld [vmem:[%s1821_s0 + $0x50] sm:$0xff] }
  0x12   :  { %278 = vperm.xlu0 %1256, %v249_v19   ;;  %v36_v26 = vld [vmem:[%s1823_s2 + $0x48] sm:$0xff]  ;;  %v37_v28 = vld [vmem:[%s1823_s2 + $0x50] sm:$0xff]  ;;  %v254_v29 = vld [vmem:[%s1821_s0 + $0x58] sm:$0xff] }
  0x13   :  { %281 = vperm.xlu1 %1257, %v250_v21   ;;  %v38_v30 = vld [vmem:[%s1823_s2 + $0x58] sm:$0xff]  ;;  %v255_v31 = vld [vmem:[%s1821_s0 + $0x60] sm:$0xff]  ;;  %v256_v33 = vld [vmem:[%s1821_s0 + $0x68] sm:$0xff] }
  0x14   :  { %1035 = vmatmul.mubr.msk.f32.gmra.mrb[4].mxu0 %vm47_vm0, %v32_v18  ;;  %v39_v32 = vld [vmem:[%s1823_s2 + $0x60] sm:$0xff]  ;;  %v40_v34 = vld [vmem:[%s1823_s2 + $0x68] sm:$0xff]  ;;  %v257_v35 = vld [vmem:[%s1821_s0 + $0x70] sm:$0xff] }
  0x15   :  { %1037 = vmatprep.mubr.msk.f32.mxu0 %vm47_vm0, %v33_v20  ;;  %v41_v36 = vld [vmem:[%s1823_s2 + $0x70] sm:$0xff]  ;;  %v258_v37 = vld [vmem:[%s1821_s0 + $0x78] sm:$0xff]  ;;  %s1328_s0 = smov 32  }
  0x16   :  { %284 = vperm.xlu0 %1256, %v251_v23   ;;  %v42_v38 = vld [vmem:[%s1823_s2 + $0x78] sm:$0xff] }
  0x17   :  { %287 = vperm.xlu1 %1257, %v252_v25  }
  0x18   :  { %1038 = vmatmul.mubr.msk.f32.gmra.mrb[6].mxu0 %vm47_vm0, %v34_v22 }
  0x19   :  { %1040 = vmatprep.mubr.msk.f32.mxu0 %vm47_vm0, %v35_v24 }
  0x1a   :  { %290 = vperm.xlu0 %1256, %v253_v27  }
  0x1b   :  { %293 = vperm.xlu1 %1257, %v254_v29  }
  0x1c   :  { %1041 = vmatmul.mubr.msk.f32.gmra.mrb[8].mxu0 %vm47_vm0, %v36_v26 }
  0x1d   :  { %1043 = vmatprep.mubr.msk.f32.mxu0 %vm47_vm0, %v37_v28 }
  0x1e   :  { %296 = vperm.xlu0 %1256, %v255_v31  }
  0x1f   :  { %299 = vperm.xlu1 %1257, %v256_v33  }
  0x20   :  { %1044 = vmatmul.mubr.msk.f32.gmra.mrb[10].mxu0 %vm47_vm0, %v38_v30 }
  0x21   :  { %1046 = vmatprep.mubr.msk.f32.mxu0 %vm47_vm0, %v39_v32 }
  0x22   :  { %302 = vperm.xlu0 %1256, %v257_v35  }
  0x23   :  { %305 = vperm.xlu1 %1257, %v258_v37  }
  0x24   :  { %1047 = vmatmul.mubr.msk.f32.gmra.mrb[12].mxu0 %vm47_vm0, %v40_v34 }
  0x25   :  { %1049 = vmatprep.mubr.msk.f32.mxu0 %vm47_vm0, %v41_v36 }
  0x28   :  { %1050 = vmatmul.mubr.msk.f32.gmra.mrb[14].mxu0 %vm47_vm0, %v42_v38  ;;  %v580_v38 = vld [vmem:[%s1822_s1] sm:$0xff] }
  0x29   :  { %1140 = vmatprep.mubr.f32.mxu0 %v580_v38  ;;  %v586_v38 = vld [vmem:[%s1822_s1 + $0x30] sm:$0xff] }
  0x82   :  { %v267_v57 = vpop.permute.xlu1 %266 }
  0x83   :  { %v261_v41 = vpop.permute.xlu0 %260  ;;  %vm309_vm2 = vcmp.eq.s32.totalorder %v267_v57, %v1495_v40 }
  0x84   :  { %vm307_vm1 = vcmp.eq.s32.totalorder %v261_v41, %v1495_v40  ;;  %v594_v41 = vld [vmem:[%s1822_s1 + $0x70] sm:$0xff] }
  0x85   :  { %1084 = vmatprep.mubr.msk.f32.mxu1 %vm307_vm1, %v1327_v42 }
  0x86   :  { %v270_v63 = vpop.permute.xlu1 %269 }
  0x87   :  { %v264_v60 = vpop.permute.xlu0 %263  ;;  %vm310_vm4 = vcmp.eq.s32.totalorder %v270_v63, %v1495_v40 }
  0x88   :  { %vm308_vm3 = vcmp.eq.s32.totalorder %v264_v60, %v1495_v40 }
  0x8d   :  { %v273_v3 = vpop.permute.xlu0 %272 }
  0x8e   :  { %v276_v6 = vpop.permute.xlu1 %275  ;;  %vm311_vm5 = vcmp.eq.s32.totalorder %v273_v3, %v1495_v40 }
  0x8f   :  { %vm312_vm6 = vcmp.eq.s32.totalorder %v276_v6, %v1495_v40 }
  0x91   :  { %v279_v8 = vpop.permute.xlu0 %278 }
  0x92   :  { %v282_v9 = vpop.permute.xlu1 %281  ;;  %vm313_vm7 = vcmp.eq.s32.totalorder %v279_v8, %v1495_v40 }
  0x93   :  { %vm314_vm8 = vcmp.eq.s32.totalorder %v282_v9, %v1495_v40 }
  0x95   :  { %v285_v10 = vpop.permute.xlu0 %284 }
  0x96   :  { %v288_v11 = vpop.permute.xlu1 %287  ;;  %vm315_vm9 = vcmp.eq.s32.totalorder %v285_v10, %v1495_v40 }
  0x97   :  { %vm316_vm10 = vcmp.eq.s32.totalorder %v288_v11, %v1495_v40 }
  0x99   :  { %v291_v12 = vpop.permute.xlu0 %290 }
  0x9a   :  { %v294_v13 = vpop.permute.xlu1 %293  ;;  %vm317_vm11 = vcmp.eq.s32.totalorder %v291_v12, %v1495_v40 }
  0x9b   :  { %vm318_vm12 = vcmp.eq.s32.totalorder %v294_v13, %v1495_v40 }
  0x9d   :  { %v297_v14 = vpop.permute.xlu0 %296 }
  0x9e   :  { %v300_v15 = vpop.permute.xlu1 %299  ;;  %vm319_vm13 = vcmp.eq.s32.totalorder %v297_v14, %v1495_v40 }
  0x9f   :  { %vm320_vm14 = vcmp.eq.s32.totalorder %v300_v15, %v1495_v40 }
  0xa1   :  { %v303_v16 = vpop.permute.xlu0 %302 }
  0xa2   :  { %vm321_vm15 = vcmp.eq.s32.totalorder %v303_v16, %v1495_v40  ;;  %v306_v17 = vpop.permute.xlu1 %305 }
  0xa3   :  { %vm322_vm1 = vcmp.eq.s32.totalorder %v306_v17, %v1495_v40 }
  0xdf   :  { %v1499_v43 = vpop.f32.mrb[0].mxu0 }
  0xe0   :  { %v1501_v44 = vpop.f32.mrb[1].mxu0 }
  0xe1   :  { %v1172_v45 = vpack.c.bf16 %v1499_v43, %v1501_v44 }
  0xe3   :  { %v1505_v46 = vpop.f32.mrb[2].mxu0  ;;  %1173 = vmatprep.subr.bf16.mxu1 %v1172_v45 }
  0xe4   :  { %v1507_v47 = vpop.f32.mrb[3].mxu0  ;;  %1175 = vmatpush3.bf16.msra.mxu1 %v1172_v45 }
  0xe5   :  { %v1176_v48 = vpack.c.bf16 %v1505_v46, %v1507_v47 }
  0xe7   :  { %v1511_v49 = vpop.f32.mrb[4].mxu0  ;;  %1177 = vmatprep.subr.bf16.mxu1 %v1176_v48 }
  0xe8   :  { %v1513_v50 = vpop.f32.mrb[5].mxu0  ;;  %1179 = vmatpush3.bf16.msra.mxu1 %v1176_v48 }
  0xe9   :  { %v1180_v51 = vpack.c.bf16 %v1511_v49, %v1513_v50 }
  0xeb   :  { %v1517_v52 = vpop.f32.mrb[6].mxu0  ;;  %1181 = vmatprep.subr.bf16.mxu1 %v1180_v51 }
  0xec   :  { %v1519_v53 = vpop.f32.mrb[7].mxu0  ;;  %1183 = vmatpush3.bf16.msra.mxu1 %v1180_v51  ;;  %v1592_v51 = vshrl.u32 %v241_v39, 7 }
  0xed   :  { %v1184_v54 = vpack.c.bf16 %v1517_v52, %v1519_v53 }
  0xee   :  { %v600_v57 = vsub.s32 0, %v1592_v51 }
  0xef   :  { %v1523_v55 = vpop.f32.mrb[8].mxu0  ;;  %1185 = vmatprep.subr.bf16.mxu1 %v1184_v54 }
  0xf0   :  { %v1525_v56 = vpop.f32.mrb[9].mxu0  ;;  %1187 = vmatpush3.bf16.msra.mxu1 %v1184_v54  ;;  %v1597_v54 = vld [vmem:[%s1825_s4] sm:$0x1] }
  0xf1   :  { %v1188_v58 = vpack.c.bf16 %v1523_v55, %v1525_v56 }
  0xf3   :  { %v1529_v59 = vpop.f32.mrb[10].mxu0  ;;  %1189 = vmatprep.subr.bf16.mxu1 %v1188_v58 }
  0xf4   :  { %v1531_v61 = vpop.f32.mrb[11].mxu0  ;;  %1191 = vmatpush3.bf16.msra.mxu1 %v1188_v58  ;;  %v601_v58 = vrot.slane %v1597_v54, %v600_v57 }
  0xf5   :  { %v1192_v62 = vpack.c.bf16 %v1529_v59, %v1531_v61 }
  0xf7   :  { %v1535_v0 = vpop.f32.mrb[12].mxu0  ;;  %1193 = vmatprep.subr.bf16.mxu1 %v1192_v62 }
  0xf8   :  { %v1537_v1 = vpop.f32.mrb[13].mxu0  ;;  %1195 = vmatpush3.bf16.msra.mxu1 %v1192_v62 }
  0xf9   :  { %v1196_v2 = vpack.c.bf16 %v1535_v0, %v1537_v1 }
  0xfb   :  { %v1541_v4 = vpop.f32.mrb[14].mxu0  ;;  %1197 = vmatprep.subr.bf16.mxu1 %v1196_v2 }
  0xfc   :  { %v1543_v5 = vpop.f32.mrb[15].mxu0  ;;  %1199 = vmatpush3.bf16.msra.mxu1 %v1196_v2 }
  0xfd   :  { %v1200_v7 = vpack.c.bf16 %v1541_v4, %v1543_v5 }
  0xff   :  { %1201 = vmatprep.subr.bf16.mxu1 %v1200_v7 }
 0x100   :  { %1203 = vmatpush3.bf16.msra.mxu1 %v1200_v7 }
 0x103   :  { %1085 = vmatmul.mubr.msk.f32.vlgmr.msra.gmra.mrb[0].mxu1 %vm308_vm3, %v1327_v42 }
 0x104   :  { %1087 = vmatprep.mubr.msk.f32.mxu1 %vm309_vm2, %v1327_v42  ;;  %vm805_vm2 = vcmask 523264  }
 0x107   :  { %1088 = vmatmul.mubr.msk.f32.gmra.mrb[2].mxu1 %vm310_vm4, %v1327_v42 }
 0x108   :  { %1090 = vmatprep.mubr.msk.f32.mxu1 %vm311_vm5, %v1327_v42 }
 0x10b   :  { %1091 = vmatmul.mubr.msk.f32.gmra.mrb[4].mxu1 %vm312_vm6, %v1327_v42 }
 0x10c   :  { %1093 = vmatprep.mubr.msk.f32.mxu1 %vm313_vm7, %v1327_v42 }
 0x10f   :  { %1094 = vmatmul.mubr.msk.f32.gmra.mrb[6].mxu1 %vm314_vm8, %v1327_v42 }
 0x110   :  { %1096 = vmatprep.mubr.msk.f32.mxu1 %vm315_vm9, %v1327_v42 }
 0x113   :  { %1097 = vmatmul.mubr.msk.f32.gmra.mrb[8].mxu1 %vm316_vm10, %v1327_v42 }
 0x114   :  { %1099 = vmatprep.mubr.msk.f32.mxu1 %vm317_vm11, %v1327_v42 }
 0x117   :  { %1100 = vmatmul.mubr.msk.f32.gmra.mrb[10].mxu1 %vm318_vm12, %v1327_v42 }
 0x118   :  { %1102 = vmatprep.mubr.msk.f32.mxu1 %vm319_vm13, %v1327_v42 }
 0x11b   :  { %1103 = vmatmul.mubr.msk.f32.gmra.mrb[12].mxu1 %vm320_vm14, %v1327_v42 }
 0x11c   :  { %1105 = vmatprep.mubr.msk.f32.mxu1 %vm321_vm15, %v1327_v42 }
 0x11f   :  { %1106 = vmatmul.mubr.msk.f32.gmra.mrb[14].mxu1 %vm322_vm1, %v1327_v42 }
 0x120   :  { %1161 = vmatprep.mubr.f32.mxu1 %v594_v41  ;;  %v588_v41 = vld [vmem:[%s1822_s1 + $0x40] sm:$0xff] }
 0x1d6   :  { %v1086_v18 = vpop.f32.mrb[0].mxu1 }
 0x1d7   :  { %v421_v19 = vpop.f32.mrb[1].mxu1 }
 0x1d8   :  { %v1258_v20 = vpack.i.bf16 %v1086_v18, %v421_v19 }
 0x1da   :  { %1259 = vrot.lane.b32.xlu0 %v1258_v20, %s1328_s0  ;;  %v1089_v21 = vpop.f32.mrb[2].mxu1 }
 0x1db   :  { %v431_v22 = vpop.f32.mrb[3].mxu1 }
 0x1dc   :  { %v1263_v23 = vpack.i.bf16 %v1089_v21, %v431_v22 }
 0x1de   :  { %1264 = vrot.lane.b32.xlu1 %v1263_v23, %s1328_s0  ;;  %v1092_v24 = vpop.f32.mrb[4].mxu1 }
 0x1df   :  { %v441_v25 = vpop.f32.mrb[5].mxu1 }
 0x1e0   :  { %v1268_v26 = vpack.i.bf16 %v1092_v24, %v441_v25 }
 0x1e2   :  { %1269 = vrot.lane.b32.xlu0 %v1268_v26, %s1328_s0  ;;  %v1095_v27 = vpop.f32.mrb[6].mxu1 }
 0x1e3   :  { %v451_v28 = vpop.f32.mrb[7].mxu1 }
 0x1e4   :  { %v1273_v29 = vpack.i.bf16 %v1095_v27, %v451_v28 }
 0x1e6   :  { %1274 = vrot.lane.b32.xlu1 %v1273_v29, %s1328_s0  ;;  %v1098_v30 = vpop.f32.mrb[8].mxu1 }
 0x1e7   :  { %v461_v31 = vpop.f32.mrb[9].mxu1 }
 0x1e8   :  { %v1278_v32 = vpack.i.bf16 %v1098_v30, %v461_v31 }
 0x1ea   :  { %1279 = vrot.lane.b32.xlu0 %v1278_v32, %s1328_s0  ;;  %v1101_v33 = vpop.f32.mrb[10].mxu1 }
 0x1eb   :  { %v471_v34 = vpop.f32.mrb[11].mxu1 }
 0x1ec   :  { %v1283_v35 = vpack.i.bf16 %v1101_v33, %v471_v34 }
 0x1ee   :  { %1284 = vrot.lane.b32.xlu1 %v1283_v35, %s1328_s0  ;;  %v1104_v36 = vpop.f32.mrb[12].mxu1  ;;  %v595_v35 = vld [vmem:[%s1822_s1 + $0x78] sm:$0xff] }
 0x1ef   :  { %v481_v37 = vpop.f32.mrb[13].mxu1 }
 0x1f0   :  { %v1288_v40 = vpack.i.bf16 %v1104_v36, %v481_v37  ;;  %v584_v36 = vld [vmem:[%s1822_s1 + $0x20] sm:$0xff]  ;;  %v585_v37 = vld [vmem:[%s1822_s1 + $0x28] sm:$0xff] }
 0x1f2   :  { %1289 = vrot.lane.b32.xlu0 %v1288_v40, %s1328_s0  ;;  %v1107_v42 = vpop.f32.mrb[14].mxu1  ;;  %v587_v40 = vld [vmem:[%s1822_s1 + $0x38] sm:$0xff] }
 0x1f3   :  { %v491_v45 = vpop.f32.mrb[15].mxu1 }
 0x1f4   :  { %v1293_v48 = vpack.i.bf16 %v1107_v42, %v491_v45  ;;  %v589_v42 = vld [vmem:[%s1822_s1 + $0x48] sm:$0xff]  ;;  %v590_v45 = vld [vmem:[%s1822_s1 + $0x50] sm:$0xff] }
 0x1f6   :  { %1294 = vrot.lane.b32.xlu1 %v1293_v48, %s1328_s0  ;;  %602 = vrot.lane.b32.xlu0 %v601_v58, %s1328_s0  ;;  %v591_v48 = vld [vmem:[%s1822_s1 + $0x58] sm:$0xff]  ;;  %v592_v58 = vld [vmem:[%s1822_s1 + $0x60] sm:$0xff] }
 0x24c   :  { %v1260_v60 = vpop.permute.xlu0 %1259 }
 0x24d   :  { %v1262_v62 = vunpack.i.h.bf16 %v1260_v60  ;;  %v1261_v63 = vunpack.i.l.bf16 %v1260_v60  ;;  %v593_v60 = vld [vmem:[%s1822_s1 + $0x68] sm:$0xff] }
 0x24f   :  { %v565_v39 = vsel %vm47_vm0, %v1499_v43, %v1262_v62  ;;  %v564_v2 = vsel %vm47_vm0, %v1501_v44, %v1261_v63 }
 0x250   :  { %v1204_v3 = vpack.c.bf16 %v565_v39, %v564_v2  ;;  %v1265_v6 = vpop.permute.xlu1 %1264 }
 0x251   :  { %v1267_v7 = vunpack.i.h.bf16 %v1265_v6  ;;  %v1266_v8 = vunpack.i.l.bf16 %v1265_v6 }
 0x252   :  { %1205 = vmatprep.subr.bf16.mxu0 %v1204_v3  ;;  %1236 = vmatprep.subr.bf16.mxu1 %v1204_v3 }
 0x253   :  { %v567_v9 = vsel %vm47_vm0, %v1505_v46, %v1267_v7  ;;  %v566_v10 = vsel %vm47_vm0, %v1507_v47, %v1266_v8  ;;  %1207 = vmatpush3.bf16.msra.mxu0 %v1204_v3  ;;  %1244 = vmatpush3.bf16.msra.mxu1 %v1204_v3  ;;  %v1687_v3 = vstv %s1826_s5 }
 0x254   :  { %v1208_v11 = vpack.c.bf16 %v567_v9, %v566_v10  ;;  %v1270_v12 = vpop.permute.xlu0 %1269 }
 0x255   :  { %v1272_v43 = vunpack.i.h.bf16 %v1270_v12  ;;  %v1271_v13 = vunpack.i.l.bf16 %v1270_v12 }
 0x256   :  { %1209 = vmatprep.subr.bf16.mxu0 %v1208_v11  ;;  %1237 = vmatprep.subr.bf16.mxu1 %v1208_v11 }
 0x257   :  { %v569_v44 = vsel %vm47_vm0, %v1511_v49, %v1272_v43  ;;  %v568_v14 = vsel %vm47_vm0, %v1513_v50, %v1271_v13  ;;  %1211 = vmatpush3.bf16.msra.mxu0 %v1208_v11  ;;  %1245 = vmatpush3.bf16.msra.mxu1 %v1208_v11 }
 0x258   :  { %v1212_v46 = vpack.c.bf16 %v569_v44, %v568_v14  ;;  %v1275_v15 = vpop.permute.xlu1 %1274 }
 0x259   :  { %v1277_v16 = vunpack.i.h.bf16 %v1275_v15  ;;  %v1276_v47 = vunpack.i.l.bf16 %v1275_v15 }
 0x25a   :  { %1213 = vmatprep.subr.bf16.mxu0 %v1212_v46  ;;  %1238 = vmatprep.subr.bf16.mxu1 %v1212_v46 }
 0x25b   :  { %v571_v17 = vsel %vm47_vm0, %v1517_v52, %v1277_v16  ;;  %v570_v18 = vsel %vm47_vm0, %v1519_v53, %v1276_v47  ;;  %1215 = vmatpush3.bf16.msra.mxu0 %v1212_v46  ;;  %1246 = vmatpush3.bf16.msra.mxu1 %v1212_v46 }
 0x25c   :  { %v1216_v49 = vpack.c.bf16 %v571_v17, %v570_v18  ;;  %v1280_v19 = vpop.permute.xlu0 %1279 }
 0x25d   :  { %v1282_v20 = vunpack.i.h.bf16 %v1280_v19  ;;  %v1281_v50 = vunpack.i.l.bf16 %v1280_v19 }
 0x25e   :  { %1217 = vmatprep.subr.bf16.mxu0 %v1216_v49  ;;  %1239 = vmatprep.subr.bf16.mxu1 %v1216_v49 }
 0x25f   :  { %v573_v21 = vsel %vm47_vm0, %v1523_v55, %v1282_v20  ;;  %v572_v22 = vsel %vm47_vm0, %v1525_v56, %v1281_v50  ;;  %1219 = vmatpush3.bf16.msra.mxu0 %v1216_v49  ;;  %1247 = vmatpush3.bf16.msra.mxu1 %v1216_v49 }
 0x260   :  { %v1220_v52 = vpack.c.bf16 %v573_v21, %v572_v22  ;;  %v1285_v23 = vpop.permute.xlu1 %1284 }
 0x261   :  { %v1287_v24 = vunpack.i.h.bf16 %v1285_v23  ;;  %v1286_v53 = vunpack.i.l.bf16 %v1285_v23 }
 0x262   :  { %1221 = vmatprep.subr.bf16.mxu0 %v1220_v52  ;;  %1240 = vmatprep.subr.bf16.mxu1 %v1220_v52 }
 0x263   :  { %v575_v25 = vsel %vm47_vm0, %v1529_v59, %v1287_v24  ;;  %v574_v26 = vsel %vm47_vm0, %v1531_v61, %v1286_v53  ;;  %1223 = vmatpush3.bf16.msra.mxu0 %v1220_v52  ;;  %1248 = vmatpush3.bf16.msra.mxu1 %v1220_v52 }
 0x264   :  { %v1224_v55 = vpack.c.bf16 %v575_v25, %v574_v26  ;;  %v1290_v27 = vpop.permute.xlu0 %1289 }
 0x265   :  { %v1292_v28 = vunpack.i.h.bf16 %v1290_v27  ;;  %v1291_v56 = vunpack.i.l.bf16 %v1290_v27 }
 0x266   :  { %1225 = vmatprep.subr.bf16.mxu0 %v1224_v55  ;;  %1241 = vmatprep.subr.bf16.mxu1 %v1224_v55 }
 0x267   :  { %v577_v29 = vsel %vm47_vm0, %v1535_v0, %v1292_v28  ;;  %v576_v30 = vsel %vm47_vm0, %v1537_v1, %v1291_v56  ;;  %1227 = vmatpush3.bf16.msra.mxu0 %v1224_v55  ;;  %1249 = vmatpush3.bf16.msra.mxu1 %v1224_v55  ;;  %v581_v1 = vld [vmem:[%s1822_s1 + $0x8] sm:$0xff] }
 0x268   :  { %v1228_v59 = vpack.c.bf16 %v577_v29, %v576_v30  ;;  %v1295_v31 = vpop.permute.xlu1 %1294  ;;  %v603_v62 = vpop.permute.xlu0 %602 }
 0x269   :  { %v1297_v32 = vunpack.i.h.bf16 %v1295_v31  ;;  %v1296_v61 = vunpack.i.l.bf16 %v1295_v31  ;;  %v605_v63 = vsel %vm47_vm0, %v1597_v54, %v603_v62 }
 0x26a   :  { %1229 = vmatprep.subr.bf16.mxu0 %v1228_v59  ;;  %1242 = vmatprep.subr.bf16.mxu1 %v1228_v59  ;;  %v1682_v39 = vrot.slane %v605_v63, %v600_v57 }
 0x26b   :  { %v579_v33 = vsel %vm47_vm0, %v1541_v4, %v1297_v32  ;;  %v578_v34 = vsel %vm47_vm0, %v1543_v5, %v1296_v61  ;;  %1231 = vmatpush3.bf16.msra.mxu0 %v1228_v59  ;;  %1250 = vmatpush3.bf16.msra.mxu1 %v1228_v59  ;;  %v582_v4 = vld [vmem:[%s1822_s1 + $0x10] sm:$0xff]  ;;  %v583_v5 = vld [vmem:[%s1822_s1 + $0x18] sm:$0xff] }
 0x26c   :  { %v1232_v0 = vpack.c.bf16 %v579_v33, %v578_v34 }
 0x26e   :  { %1233 = vmatprep.subr.bf16.mxu0 %v1232_v0  ;;  %1243 = vmatprep.subr.bf16.mxu1 %v1232_v0 }
 0x26f   :  { %1235 = vmatpush3.bf16.msra.mxu0 %v1232_v0  ;;  %1251 = vmatpush3.bf16.msra.mxu1 %v1232_v0 }
 0x272   :  { %1141 = vmatmul.mubr.f32.vlgmr.msra.gmra.mrb[16].mxu0 %v581_v1  ;;  %1162 = vmatmul.mubr.f32.vlgmr.msra.gmra.mrb[16].mxu1 %v595_v35 }
 0x273   :  { %1143 = vmatprep.mubr.f32.mxu0 %v582_v4 }
 0x276   :  { %1144 = vmatmul.mubr.f32.gmra.mrb[18].mxu0 %v583_v5 }
 0x277   :  { %1146 = vmatprep.mubr.f32.mxu0 %v584_v36 }
 0x27a   :  { %1147 = vmatmul.mubr.f32.gmra.mrb[20].mxu0 %v585_v37 }
 0x27b   :  { %1149 = vmatprep.mubr.f32.mxu0 %v586_v38 }
 0x27e   :  { %1150 = vmatmul.mubr.f32.gmra.mrb[22].mxu0 %v587_v40 }
 0x27f   :  { %1152 = vmatprep.mubr.f32.mxu0 %v588_v41 }
 0x282   :  { %1153 = vmatmul.mubr.f32.gmra.mrb[24].mxu0 %v589_v42 }
 0x283   :  { %1155 = vmatprep.mubr.f32.mxu0 %v590_v45 }
 0x286   :  { %1156 = vmatmul.mubr.f32.gmra.mrb[26].mxu0 %v591_v48 }
 0x287   :  { %1158 = vmatprep.mubr.f32.mxu0 %v592_v58 }
 0x28a   :  { %1159 = vmatmul.mubr.f32.gmra.mrb[28].mxu0 %v593_v60 }
 0x345   :  { %v1142_v2 = vpop.f32.mrb[16].mxu0  ;;  %v1163_v6 = vpop.f32.mrb[16].mxu1 }
 0x346   :  { %v682_v7 = vadd.f32 %v1142_v2, %v1682_v39  ;;  %v676_v8 = vpop.f32.mrb[17].mxu0  ;;  %v752_v9 = vadd.f32 %v1163_v6, %v1682_v39  ;;  %v746_v10 = vpop.f32.mrb[17].mxu1 }
 0x347   :  { %v677_v54 = vadd.f32 %v676_v8, %v1682_v39  ;;  %v747_v51 = vadd.f32 %v746_v10, %v1682_v39 }
 0x348   :  { %vm757_vm3 = vcmp.gt.f32.partialorder %v682_v7, 0.0  ;;  %v774_v57 = vmul.f32 %v1687_v3, %v682_v7  ;;  %vm771_vm4 = vcmp.gt.f32.partialorder %v752_v9, 0.0  ;;  %v788_v11 = vmul.f32 %v1687_v3, %v752_v9 }
 0x349   :  { %vm756_vm5 = vcmp.gt.f32.partialorder %v677_v54, 0.0  ;;  %v773_v12 = vmul.f32 %v1687_v3, %v677_v54  ;;  %vm770_vm6 = vcmp.gt.f32.partialorder %v747_v51, 0.0  ;;  %v787_v43 = vmul.f32 %v1687_v3, %v747_v51  ;;  %v1145_v13 = vpop.f32.mrb[18].mxu0 }
 0x34a   :  { %v790_v44 = vsel %vm757_vm3, %v682_v7, %v774_v57  ;;  %v1697_v14 = vsel %vm771_vm4, %v752_v9, %v788_v11  ;;  %v692_v46 = vadd.f32 %v1145_v13, %v1682_v39  ;;  %v686_v15 = vpop.f32.mrb[19].mxu0 }
 0x34b   :  { %807 = vst.msk [vmem:[%s1827_s6 + $0x8] sm:$0xff] %vm805_vm2, %v790_v44  ;;  %v823_v16 = vsel %vm47_vm0, %v790_v44, 0.0  ;;  %v789_v47 = vsel %vm756_vm5, %v677_v54, %v773_v12  ;;  %821 = vst.msk [vmem:[%s1827_s6 + $0x78] sm:$0xff] %vm805_vm2, %v1697_v14  ;;  %v1710_v17 = vsel %vm770_vm6, %v747_v51, %v787_v43  ;;  %v687_v20 = vadd.f32 %v686_v15, %v1682_v39 }
 0x34c   :  { %806 = vst.msk [vmem:[%s1827_s6] sm:$0xff] %vm805_vm2, %v789_v47  ;;  %v822_v18 = vsel %vm47_vm0, %v789_v47, 0.0  ;;  %820 = vst.msk [vmem:[%s1827_s6 + $0x70] sm:$0xff] %vm805_vm2, %v1710_v17  ;;  %vm759_vm7 = vcmp.gt.f32.partialorder %v692_v46, 0.0  ;;  %v776_v49 = vmul.f32 %v1687_v3, %v692_v46 }
 0x34d   :  { %v824_v19 = vadd.f32 %v823_v16, %v822_v18  ;;  %v1148_v50 = vpop.f32.mrb[20].mxu0  ;;  %vm758_vm8 = vcmp.gt.f32.partialorder %v687_v20, 0.0  ;;  %v775_v23 = vmul.f32 %v1687_v3, %v687_v20 }
 0x34e   :  { %v792_v21 = vsel %vm759_vm7, %v692_v46, %v776_v49  ;;  %v702_v22 = vadd.f32 %v1148_v50, %v1682_v39  ;;  %v696_v52 = vpop.f32.mrb[21].mxu0 }
 0x34f   :  { %809 = vst.msk [vmem:[%s1827_s6 + $0x18] sm:$0xff] %vm805_vm2, %v792_v21  ;;  %v697_v24 = vadd.f32 %v696_v52, %v1682_v39  ;;  %v791_v25 = vsel %vm758_vm8, %v687_v20, %v775_v23  ;;  %v827_v32 = vsel %vm47_vm0, %v792_v21, 0.0 }
 0x350   :  { %vm761_vm9 = vcmp.gt.f32.partialorder %v702_v22, 0.0  ;;  %v778_v53 = vmul.f32 %v1687_v3, %v702_v22  ;;  %808 = vst.msk [vmem:[%s1827_s6 + $0x10] sm:$0xff] %vm805_vm2, %v791_v25  ;;  %v825_v27 = vsel %vm47_vm0, %v791_v25, 0.0  ;;  %v851_v25 = vsel %vm47_vm0, %v1697_v14, 0.0 }
 0x351   :  { %vm760_vm10 = vcmp.gt.f32.partialorder %v697_v24, 0.0  ;;  %v777_v26 = vmul.f32 %v1687_v3, %v697_v24  ;;  %v1151_v55 = vpop.f32.mrb[22].mxu0  ;;  %v826_v30 = vadd.f32 %v825_v27, %v824_v19 }
 0x352   :  { %v794_v28 = vsel %vm761_vm9, %v702_v22, %v778_v53  ;;  %v712_v56 = vadd.f32 %v1151_v55, %v1682_v39  ;;  %v706_v29 = vpop.f32.mrb[23].mxu0 }
 0x353   :  { %811 = vst.msk [vmem:[%s1827_s6 + $0x28] sm:$0xff] %vm805_vm2, %v794_v28  ;;  %v793_v59 = vsel %vm760_vm10, %v697_v24, %v777_v26  ;;  %v707_v31 = vadd.f32 %v706_v29, %v1682_v39  ;;  %v828_v34 = vadd.f32 %v827_v32, %v826_v30  ;;  %v831_v40 = vsel %vm47_vm0, %v794_v28, 0.0 }
 0x354   :  { %810 = vst.msk [vmem:[%s1827_s6 + $0x20] sm:$0xff] %vm805_vm2, %v793_v59  ;;  %v829_v61 = vsel %vm47_vm0, %v793_v59, 0.0  ;;  %vm763_vm11 = vcmp.gt.f32.partialorder %v712_v56, 0.0  ;;  %v780_v33 = vmul.f32 %v1687_v3, %v712_v56  ;;  %v849_v24 = vsel %vm47_vm0, %v1710_v17, 0.0 }
 0x355   :  { %vm762_vm12 = vcmp.gt.f32.partialorder %v707_v31, 0.0  ;;  %v779_v0 = vmul.f32 %v1687_v3, %v707_v31  ;;  %v1154_v1 = vpop.f32.mrb[24].mxu0  ;;  %v830_v36 = vadd.f32 %v829_v61, %v828_v34 }
 0x356   :  { %v796_v35 = vsel %vm763_vm11, %v712_v56, %v780_v33  ;;  %v722_v4 = vadd.f32 %v1154_v1, %v1682_v39  ;;  %v716_v5 = vpop.f32.mrb[25].mxu0 }
 0x357   :  { %813 = vst.msk [vmem:[%s1827_s6 + $0x38] sm:$0xff] %vm805_vm2, %v796_v35  ;;  %v795_v37 = vsel %vm762_vm12, %v707_v31, %v779_v0  ;;  %v717_v38 = vadd.f32 %v716_v5, %v1682_v39  ;;  %v832_v45 = vadd.f32 %v831_v40, %v830_v36  ;;  %v835_v8 = vsel %vm47_vm0, %v796_v35, 0.0 }
 0x358   :  { %812 = vst.msk [vmem:[%s1827_s6 + $0x30] sm:$0xff] %vm805_vm2, %v795_v37  ;;  %v833_v41 = vsel %vm47_vm0, %v795_v37, 0.0  ;;  %vm765_vm13 = vcmp.gt.f32.partialorder %v722_v4, 0.0  ;;  %v782_v42 = vmul.f32 %v1687_v3, %v722_v4 }
 0x359   :  { %vm764_vm14 = vcmp.gt.f32.partialorder %v717_v38, 0.0  ;;  %v781_v48 = vmul.f32 %v1687_v3, %v717_v38  ;;  %v1157_v58 = vpop.f32.mrb[26].mxu0  ;;  %v834_v2 = vadd.f32 %v833_v41, %v832_v45 }
 0x35a   :  { %v798_v60 = vsel %vm765_vm13, %v722_v4, %v782_v42  ;;  %v732_v62 = vadd.f32 %v1157_v58, %v1682_v39  ;;  %v726_v63 = vpop.f32.mrb[27].mxu0 }
 0x35b   :  { %815 = vst.msk [vmem:[%s1827_s6 + $0x48] sm:$0xff] %vm805_vm2, %v798_v60  ;;  %v797_v6 = vsel %vm764_vm14, %v717_v38, %v781_v48  ;;  %v727_v7 = vadd.f32 %v726_v63, %v1682_v39  ;;  %v836_v54 = vadd.f32 %v835_v8, %v834_v2  ;;  %v839_v15 = vsel %vm47_vm0, %v798_v60, 0.0 }
 0x35c   :  { %814 = vst.msk [vmem:[%s1827_s6 + $0x40] sm:$0xff] %vm805_vm2, %v797_v6  ;;  %v837_v9 = vsel %vm47_vm0, %v797_v6, 0.0  ;;  %vm767_vm15 = vcmp.gt.f32.partialorder %v732_v62, 0.0  ;;  %v784_v10 = vmul.f32 %v1687_v3, %v732_v62 }
 0x35d   :  { %vm766_vm1 = vcmp.gt.f32.partialorder %v727_v7, 0.0  ;;  %v783_v51 = vmul.f32 %v1687_v3, %v727_v7  ;;  %v1160_v57 = vpop.f32.mrb[28].mxu0  ;;  %v838_v13 = vadd.f32 %v837_v9, %v836_v54 }
 0x35e   :  { %v800_v11 = vsel %vm767_vm15, %v732_v62, %v784_v10  ;;  %v742_v12 = vadd.f32 %v1160_v57, %v1682_v39  ;;  %v736_v43 = vpop.f32.mrb[29].mxu0 }
 0x35f   :  { %817 = vst.msk [vmem:[%s1827_s6 + $0x58] sm:$0xff] %vm805_vm2, %v800_v11  ;;  %v799_v44 = vsel %vm766_vm1, %v727_v7, %v783_v51  ;;  %v737_v46 = vadd.f32 %v736_v43, %v1682_v39  ;;  %v840_v18 = vadd.f32 %v839_v15, %v838_v13  ;;  %v843_v50 = vsel %vm47_vm0, %v800_v11, 0.0 }
 0x360   :  { %816 = vst.msk [vmem:[%s1827_s6 + $0x50] sm:$0xff] %vm805_vm2, %v799_v44  ;;  %v841_v16 = vsel %vm47_vm0, %v799_v44, 0.0  ;;  %vm769_vm3 = vcmp.gt.f32.partialorder %v742_v12, 0.0  ;;  %v786_v47 = vmul.f32 %v1687_v3, %v742_v12 }
 0x361   :  { %vm768_vm4 = vcmp.gt.f32.partialorder %v737_v46, 0.0  ;;  %v785_v49 = vmul.f32 %v1687_v3, %v737_v46  ;;  %v842_v20 = vadd.f32 %v841_v16, %v840_v18 }
 0x362   :  { %v802_v19 = vsel %vm769_vm3, %v742_v12, %v786_v47 }
 0x363   :  { %819 = vst.msk [vmem:[%s1827_s6 + $0x68] sm:$0xff] %vm805_vm2, %v802_v19  ;;  %v801_v39 = vsel %vm768_vm4, %v737_v46, %v785_v49  ;;  %v844_v22 = vadd.f32 %v843_v50, %v842_v20  ;;  %v847_v3 = vsel %vm47_vm0, %v802_v19, 0.0 }
 0x364   :  { %818 = vst.msk [vmem:[%s1827_s6 + $0x60] sm:$0xff] %vm805_vm2, %v801_v39  ;;  %v845_v21 = vsel %vm47_vm0, %v801_v39, 0.0  ;;  %s1329_s6 = smov [#allocation3]   ;;  %vm867_vm2 = vcmask 253952  }
 0x365   :  { %v846_v52 = vadd.f32 %v845_v21, %v844_v22  ;;  %s877_s9 = sshll.u32 %s1329_s6, 4  ;;  %s878_s9 = int_to_ptr.vmem [resolvable:$true] %s877_s9 }
 0x366   :  { %s1302_s10 = scalar_lea.vmem %s878_s9, 16  ;;  %s1306_s11 = scalar_lea.vmem %s878_s9, 32 }
 0x367   :  { %v848_v23 = vadd.f32 %v847_v3, %v846_v52  ;;  %p1303_p0 = scmp.ne.s32.totalorder %s878_s9, %s1302_s10  ;;  %p1307_p1 = scmp.lt.s32.totalorder %s878_s9, %s878_s9 }
 0x368   :  { %p1308_p2 = scmp.lt.s32.totalorder %s1306_s11, %s1302_s10 }
 0x369   :  { %v850_v53 = vadd.f32 %v849_v24, %v848_v23 }
 0x36a   :  { %p1309_p3 = por %p1308_p2, %p1307_p1 }
 0x36b   :  { %v852_v26 = vadd.f32 %v851_v25, %v850_v53 }
 0x36c   :  { %p1310_p4 = pnand %p1309_p3, %p1303_p0 }
 0x36d   :  { %v853_v55 = vrot.slane %v852_v26, 4 }
 0x36f   :  { %v854_v27 = vadd.f32 %v853_v55, %v852_v26 }
 0x371   :  { %v855_v28 = vrot.slane %v854_v27, 2 }
 0x373   :  { %v856_v56 = vadd.f32 %v855_v28, %v854_v27 }
 0x375   :  { %v857_v29 = vrot.slane %v856_v56, 1 }
 0x377   :  { %v858_v30 = vadd.f32 %v857_v29, %v856_v56 }
 0x379   :  { %v935_v59 = vmul.f32 -0.0078125, %v858_v30 }
 0x37b   :  { %v862_v31 = vmul.f32 1.442695, %v935_v59 }
 0x37d   :  { %1298 = vpow2.f32 %v862_v31 }
 0x387   :  { %v1299_v32 = vpop.eup %1298 }
 0x388   :  { %v864_v61 = vadd.f32 1.0, %v1299_v32 }
 0x38a   :  { %1300 = vrcp.f32 %v864_v61 }
 0x394   :  { %v1301_v17 = vpop.eup %1300 }
 0x395   :  { %868 = vst.msk [vmem:[#allocation3] sm:$0x1] %vm867_vm2, %v1301_v17 }
 0x396   :  { %1313 = shalt.err (!%p1310_p4)
}
 0x397   :  { %s1314_s3 = scalar_lea.hbm %s1828_s7, 16 }
 0x398   :  { %p1315_p5 = scmp.ne.s32.totalorder %s1828_s7, %s1314_s3  ;;  %p1318_p6 = scmp.lt.u32.totalorder %s1314_s3, %s1828_s7 }
 0x39a   :  { %p1320_p7 = pnand %p1318_p6, %p1315_p5 }
 0x39c   :  { %1323 = shalt.err (!%p1320_p7)
}
 0x39d   :  { %880 = dma.vmem_to_hbm [thread:$0]  %s878_s9, 16, %s1828_s7, [#allocation4]  }
 0x39e   :  { %1324 = dma.done.wait [#allocation4], 16  }
 0x39f   :  { %1325 = vsyncadd [#allocation4], 4294967280 }
 0x3a0   :  { %886 = vsyncpa [#allocation4], 1 }

</bundles_post_ra>
